<compile_context>
chip_gen: v7x
topology: tpu7x:2x2x1
jax: 0.10.0
libtpu: 0.0.40
codegen_flags: <defaults>
</compile_context>

<pallas_src>
import functools

import jax
import jax.numpy as jnp
from jax.experimental import pallas as pl
from jax.experimental.pallas import tpu as pltpu

LEAKY_SLOPE = 0.01
BN_EPS = 1e-5

_K_SINGLE_MAX = 2048   # K <= this -> one full-extent K block (no K grid axis)
_TK = 2048             # K tile when the K grid axis is used
_TM_MAX = 128
_TN_MAX = 512


def _round_up(x, m):
    return ((x + m - 1) // m) * m


def _pad_to(x, m, axis):
    pad = (-x.shape[axis]) % m
    if pad == 0:
        return x
    cfg = [(0, 0)] * x.ndim
    cfg[axis] = (0, pad)
    return jnp.pad(x, cfg)


def _apply_act(y, act):
    if act == "leaky_relu":
        return jnp.where(y >= 0, y, LEAKY_SLOPE * y)
    if act == "sigmoid":
        return jax.nn.sigmoid(y)
    return y


# ----------------------------------------------------------------------------
# Pallas kernels: out = act(X @ W + b)   (bf16 operands, f32 accumulate)
# ----------------------------------------------------------------------------
def _mm_kernel_single(x_ref, w_ref, b_ref, o_ref, *, act):
    # Single K block: no accumulator scratch needed.
    y = jnp.dot(x_ref[...], w_ref[...], preferred_element_type=jnp.float32)
    y = y + b_ref[...]
    o_ref[...] = _apply_act(y, act).astype(o_ref.dtype)


def _mm_kernel_ktiled(x_ref, w_ref, b_ref, o_ref, acc_ref, *, act):
    k = pl.program_id(2)

    @pl.when(k == 0)
    def _():
        acc_ref[...] = jnp.zeros_like(acc_ref)

    acc_ref[...] += jnp.dot(x_ref[...], w_ref[...],
                            preferred_element_type=jnp.float32)

    @pl.when(k == pl.num_programs(2) - 1)
    def _():
        y = acc_ref[...] + b_ref[...]
        o_ref[...] = _apply_act(y, act).astype(o_ref.dtype)


def fused_matmul(x, w, b=None, act="none", out_dtype=jnp.float32):
    """act(x @ w + b). bf16 MXU operands, f32 accumulation/epilogue."""
    M, K = x.shape
    _, N = w.shape
    if b is None:
        b = jnp.zeros((N,), jnp.float32)

    tm = min(_round_up(M, 8), _TM_MAX)
    tn = min(_round_up(N, 128), _TN_MAX)

    xp = _pad_to(x.astype(jnp.bfloat16), tm, 0)
    wp = _pad_to(w.astype(jnp.bfloat16), tn, 1)
    bp = _pad_to(b.reshape(1, N).astype(jnp.float32), tn, 1)

    if K <= _K_SINGLE_MAX:
        # Light K padding (multiple of 8); full-extent K block is legal even
        # if not a 128-multiple on the lane axis.
        xp = _pad_to(xp, 8, 1)
        wp = _pad_to(wp, 8, 0)
        Mp, Kp = xp.shape
        Np = wp.shape[1]
        grid = (Mp // tm, Np // tn)
        out = pl.pallas_call(
            functools.partial(_mm_kernel_single, act=act),
            out_shape=jax.ShapeDtypeStruct((Mp, Np), out_dtype),
            grid_spec=pltpu.PrefetchScalarGridSpec(
                num_scalar_prefetch=0,
                grid=grid,
                in_specs=[
                    pl.BlockSpec((tm, Kp), lambda i, j: (i, 0)),
                    pl.BlockSpec((Kp, tn), lambda i, j: (0, j)),
                    pl.BlockSpec((1, tn), lambda i, j: (0, j)),
                ],
                out_specs=pl.BlockSpec((tm, tn), lambda i, j: (i, j)),
            ),
            compiler_params=pltpu.CompilerParams(
                dimension_semantics=("parallel", "parallel")),
        )(xp, wp, bp)
    else:
        tk = _TK
        xp = _pad_to(xp, tk, 1)
        wp = _pad_to(wp, tk, 0)
        Mp, Kp = xp.shape
        Np = wp.shape[1]
        grid = (Mp // tm, Np // tn, Kp // tk)
        out = pl.pallas_call(
            functools.partial(_mm_kernel_ktiled, act=act),
            out_shape=jax.ShapeDtypeStruct((Mp, Np), out_dtype),
            grid_spec=pltpu.PrefetchScalarGridSpec(
                num_scalar_prefetch=0,
                grid=grid,
                in_specs=[
                    pl.BlockSpec((tm, tk), lambda i, j, k: (i, k)),
                    pl.BlockSpec((tk, tn), lambda i, j, k: (k, j)),
                    pl.BlockSpec((1, tn), lambda i, j, k: (0, j)),
                ],
                out_specs=pl.BlockSpec((tm, tn), lambda i, j, k: (i, j)),
                scratch_shapes=[pltpu.VMEM((tm, tn), jnp.float32)],
            ),
            compiler_params=pltpu.CompilerParams(
                dimension_semantics=("parallel", "parallel", "arbitrary")),
        )(xp, wp, bp)
    return out[:M, :N]


# ----------------------------------------------------------------------------
# Conv via im2col + fused matmul (BatchNorm folded into weight/bias)
# ----------------------------------------------------------------------------
def _im2col(x_nhwc, ksize, stride, pad_lo, pad_hi):
    N, H, W, C = x_nhwc.shape
    xp = jnp.pad(x_nhwc, ((0, 0), (pad_lo, pad_hi), (pad_lo, pad_hi), (0, 0)))
    Ho = (H + pad_lo + pad_hi - ksize) // stride + 1
    Wo = (W + pad_lo + pad_hi - ksize) // stride + 1
    patches = []
    for kh in range(ksize):
        for kw in range(ksize):
            patches.append(
                xp[:, kh:kh + stride * Ho:stride, kw:kw + stride * Wo:stride, :])
    cols = jnp.stack(patches, axis=3)  # (N, Ho, Wo, k*k, C)
    return cols.reshape(N * Ho * Wo, ksize * ksize * C), (N, Ho, Wo)


def conv2d_bn_act(x_nhwc, w_oihw, conv_b, bn_scale, bn_shift, *, stride,
                  padding, act, out_dtype=jnp.bfloat16):
    Cout, Cin, K, _ = w_oihw.shape
    cols, (N, Ho, Wo) = _im2col(x_nhwc, K, stride, padding, padding)
    wmat = jnp.transpose(w_oihw, (2, 3, 1, 0)).reshape(K * K * Cin, Cout)
    wmat = wmat.astype(jnp.float32)
    if bn_scale is not None:
        # y = (x@W + b)*scale + shift  ==  x@(W*scale) + (b*scale + shift)
        wmat = wmat * bn_scale[None, :]
        bias = conv_b * bn_scale + bn_shift
    else:
        bias = conv_b
    out = fused_matmul(cols, wmat, bias, act=act, out_dtype=out_dtype)
    return out.reshape(N, Ho, Wo, Cout)


def convtranspose2d_bn_act(x_nhwc, w_iohw, conv_b, bn_scale, bn_shift, *, act,
                           out_dtype=jnp.bfloat16):
    """ConvTranspose2d(k=3, stride=2, padding=1, output_padding=1) via
    sub-pixel decomposition (no zero-stuffing)."""
    Cin, Cout, K, _ = w_iohw.shape
    assert K == 3
    N, H, W, _ = x_nhwc.shape

    # 2x2 im2col of the raw input (zero-padded by one at bottom/right).
    xp = jnp.pad(x_nhwc, ((0, 0), (0, 1), (0, 1), (0, 0)))
    patches = [xp[:, di:di + H, dj:dj + W, :] for di in (0, 1) for dj in (0, 1)]
    cols = jnp.stack(patches, axis=3).reshape(N * H * W, 4 * Cin)

    # W4[slot(di,dj), ci, sub-pixel(ph,pw), co]
    w = w_iohw.astype(jnp.float32)
    w4 = jnp.zeros((4, Cin, 4, Cout), jnp.float32)

    def put(w4, di, dj, ph, pw, kh, kw):
        return w4.at[di * 2 + dj, :, ph * 2 + pw, :].set(w[:, :, kh, kw])

    # out[2i, 2j]       = in[i,j]*w[1,1]
    w4 = put(w4, 0, 0, 0, 0, 1, 1)
    # out[2i, 2j+1]     = in[i,j]*w[1,2] + in[i,j+1]*w[1,0]
    w4 = put(w4, 0, 0, 0, 1, 1, 2)
    w4 = put(w4, 0, 1, 0, 1, 1, 0)
    # out[2i+1, 2j]     = in[i,j]*w[2,1] + in[i+1,j]*w[0,1]
    w4 = put(w4, 0, 0, 1, 0, 2, 1)
    w4 = put(w4, 1, 0, 1, 0, 0, 1)
    # out[2i+1, 2j+1]   = in[i,j]*w[2,2] + in[i,j+1]*w[2,0]
    #                   + in[i+1,j]*w[0,2] + in[i+1,j+1]*w[0,0]
    w4 = put(w4, 0, 0, 1, 1, 2, 2)
    w4 = put(w4, 0, 1, 1, 1, 2, 0)
    w4 = put(w4, 1, 0, 1, 1, 0, 2)
    w4 = put(w4, 1, 1, 1, 1, 0, 0)
    wmat = w4.reshape(4 * Cin, 4 * Cout)

    if bn_scale is not None:
        wmat = wmat * jnp.tile(bn_scale, 4)[None, :]
        bias = jnp.tile(conv_b * bn_scale + bn_shift, 4)
    else:
        bias = jnp.tile(conv_b, 4)

    out = fused_matmul(cols, wmat, bias, act=act, out_dtype=out_dtype)
    out = out.reshape(N, H, W, 2, 2, Cout)
    out = jnp.transpose(out, (0, 1, 3, 2, 4, 5)).reshape(N, 2 * H, 2 * W, Cout)
    return out


# ----------------------------------------------------------------------------
# Deterministic parameter init (shapes follow the PyTorch module __init__)
# ----------------------------------------------------------------------------
def _linear_init(key, fan_in, fan_out):
    kw, kb = jax.random.split(key)
    bound = 1.0 / (fan_in ** 0.5)
    w = jax.random.uniform(kw, (fan_in, fan_out), jnp.float32, -bound, bound)
    b = jax.random.uniform(kb, (fan_out,), jnp.float32, -bound, bound)
    return w, b


def _conv_init(key, cin, cout, k=3):
    kw, kb = jax.random.split(key)
    bound = 1.0 / ((cin * k * k) ** 0.5)
    w = jax.random.uniform(kw, (cout, cin, k, k), jnp.float32, -bound, bound)
    b = jax.random.uniform(kb, (cout,), jnp.float32, -bound, bound)
    return w, b


def _convT_init(key, cin, cout, k=3):
    kw, kb = jax.random.split(key)
    bound = 1.0 / ((cin * k * k) ** 0.5)
    w = jax.random.uniform(kw, (cin, cout, k, k), jnp.float32, -bound, bound)
    b = jax.random.uniform(kb, (cout,), jnp.float32, -bound, bound)
    return w, b


def _bn_init(key, c):
    k1, k2, k3, k4 = jax.random.split(key, 4)
    gamma = 1.0 + 0.1 * jax.random.normal(k1, (c,), jnp.float32)
    beta = 0.1 * jax.random.normal(k2, (c,), jnp.float32)
    mean = 0.1 * jax.random.normal(k3, (c,), jnp.float32)
    var = 1.0 + 0.1 * jax.random.uniform(k4, (c,), jnp.float32)
    scale = gamma / jnp.sqrt(var + BN_EPS)
    shift = beta - mean * scale
    return scale, shift


def init_vae_params(key, in_channels, latent_dim, hidden_dims):
    hidden_dims = list(hidden_dims)
    keys = iter(jax.random.split(key, 64))
    params = {}

    enc, cin = [], in_channels
    for h in hidden_dims:
        w, b = _conv_init(next(keys), cin, h)
        scale, shift = _bn_init(next(keys), h)
        enc.append(dict(w=w, b=b, scale=scale, shift=shift))
        cin = h
    params["encoder"] = enc

    feat = hidden_dims[-1] * 4 * 4
    params["fc_mu"] = dict(zip(("w", "b"), _linear_init(next(keys), feat, latent_dim)))
    params["fc_var"] = dict(zip(("w", "b"), _linear_init(next(keys), feat, latent_dim)))
    params["decoder_input"] = dict(
        zip(("w", "b"), _linear_init(next(keys), latent_dim, feat)))

    rev = hidden_dims[::-1]

    def make_decoder():
        layers = []
        for i in range(len(rev) - 1):
            w, b = _convT_init(next(keys), rev[i], rev[i + 1])
            scale, shift = _bn_init(next(keys), rev[i + 1])
            layers.append(dict(w=w, b=b, scale=scale, shift=shift))
        return layers

    params["decoder_a"] = make_decoder()
    params["decoder_b"] = make_decoder()

    ct_w, ct_b = _convT_init(next(keys), rev[-1], rev[-1])
    scale, shift = _bn_init(next(keys), rev[-1])
    conv_w, conv_b = _conv_init(next(keys), rev[-1], 3)
    params["final"] = dict(ct_w=ct_w, ct_b=ct_b, scale=scale, shift=shift,
                           conv_w=conv_w, conv_b=conv_b)
    return params


# ----------------------------------------------------------------------------
# VAE forward
# ----------------------------------------------------------------------------
def vae_forward(params, x_nchw, noise_key, a_decoder=True):
    x = jnp.transpose(x_nchw, (0, 2, 3, 1)).astype(jnp.bfloat16)  # NCHW->NHWC

    # encoder
    h = x
    for layer in params["encoder"]:
        h = conv2d_bn_act(h, layer["w"], layer["b"], layer["scale"],
                          layer["shift"], stride=2, padding=1,
                          act="leaky_relu", out_dtype=jnp.bfloat16)
    B = h.shape[0]
    # torch.flatten(result, 1) on NCHW flattens in (C, H, W) order.
    flat = jnp.transpose(h, (0, 3, 1, 2)).reshape(B, -1)

    # fc_mu and fc_var share the same input: fuse into one matmul.
    latent = params["fc_mu"]["w"].shape[1]
    w_mu_var = jnp.concatenate(
        [params["fc_mu"]["w"], params["fc_var"]["w"]], axis=1)
    b_mu_var = jnp.concatenate([params["fc_mu"]["b"], params["fc_var"]["b"]])
    mu_var = fused_matmul(flat, w_mu_var, b_mu_var, out_dtype=jnp.float32)
    mu, log_var = mu_var[:, :latent], mu_var[:, latent:]

    # reparameterize
    std = jnp.exp(0.5 * log_var)
    eps = jax.random.normal(noise_key, std.shape, std.dtype)
    z = eps * std + mu

    # decode
    dec_in = fused_matmul(z, params["decoder_input"]["w"],
                          params["decoder_input"]["b"],
                          out_dtype=jnp.bfloat16)
    h = dec_in.reshape(B, 512, 4, 4)              # matches .view(-1, 512, 4, 4)
    h = jnp.transpose(h, (0, 2, 3, 1))            # NCHW -> NHWC

    dec = params["decoder_a"] if a_decoder else params["decoder_b"]
    for layer in dec:
        h = convtranspose2d_bn_act(h, layer["w"], layer["b"], layer["scale"],
                                   layer["shift"], act="leaky_relu")

    fl = params["final"]
    h = convtranspose2d_bn_act(h, fl["ct_w"], fl["ct_b"], fl["scale"],
                               fl["shift"], act="leaky_relu")
    h = conv2d_bn_act(h, fl["conv_w"], fl["conv_b"], None, None,
                      stride=1, padding=1, act="sigmoid",
                      out_dtype=jnp.float32)

    recon = jnp.transpose(h, (0, 3, 1, 2)).astype(jnp.float32)  # NHWC -> NCHW
    return recon, x_nchw, mu, log_var


# ----------------------------------------------------------------------------
# Lightweight numerical self-checks (bf16-rounded references)
# ----------------------------------------------------------------------------
def _self_check(key):
    k1, k2, k3, k4, k5, k6, k7 = jax.random.split(key, 7)

    def _bf(a):
        return a.astype(jnp.bfloat16).astype(jnp.float32)

    # single-K-block path, awkward (non-aligned) shapes
    x = jax.random.normal(k1, (10, 27), jnp.float32)
    w = jax.random.normal(k2, (27, 70), jnp.float32)
    b = jax.random.normal(k3, (70,), jnp.float32)
    got = fused_matmul(x, w, b)
    ref = _bf(x) @ _bf(w) + b
    assert bool(jnp.allclose(got, ref, rtol=5e-3, atol=5e-3)), "single-K matmul"

    # K-tiled path
    x = jax.random.normal(k1, (4, 4096), jnp.float32)
    w = jax.random.normal(k2, (4096, 130), jnp.float32)
    b = jax.random.normal(k3, (130,), jnp.float32)
    got = fused_matmul(x, w, b)
    ref = _bf(x) @ _bf(w) + b
    assert bool(jnp.allclose(got, ref, rtol=5e-3, atol=5e-3)), "K-tiled matmul"

    # sub-pixel ConvTranspose2d vs. zero-stuffed reference
    cin, cout, H = 8, 8, 4
    xt = jax.random.normal(k4, (1, H, H, cin), jnp.float32)
    wt = jax.random.normal(k5, (cin, cout, 3, 3), jnp.float32) * 0.2
    bt = jax.random.normal(k6, (cout,), jnp.float32) * 0.1
    scale, shift = _bn_init(k7, cout)
    got = convtranspose2d_bn_act(xt, wt, bt, scale, shift, act="leaky_relu",
                                 out_dtype=jnp.float32)
    # reference: zero-stuffed equivalent conv, plain jnp, same BN fold.
    z = jnp.zeros((1, 2 * H - 1, 2 * H - 1, cin), jnp.float32)
    z = z.at[:, ::2, ::2, :].set(xt)
    w_conv = jnp.transpose(wt[:, :, ::-1, ::-1], (1, 0, 2, 3))
    cols, (n2, ho, wo) = _im2col(z, 3, 1, 1, 2)
    wmat = jnp.transpose(w_conv, (2, 3, 1, 0)).reshape(9 * cin, cout)
    wmat = wmat * scale[None, :]
    bias = bt * scale + shift
    y = _bf(cols) @ _bf(wmat) + bias
    y = jnp.where(y >= 0, y, LEAKY_SLOPE * y)
    ref = y.reshape(n2, ho, wo, cout)
    assert bool(jnp.allclose(got, ref, rtol=5e-3, atol=5e-3)), "convT subpixel"


if __name__ == "__main__":
    # Small but structurally-faithful config: hidden_dims[-1] must be 512
    # (the PyTorch module hard-codes .view(-1, 512, 4, 4)); with 2 stride-2
    # encoder convs the 4x4 bottleneck implies a 16x16 input.
    key = jax.random.PRNGKey(0)
    pkey, xkey, ekey, ckey = jax.random.split(key, 4)

    _self_check(ckey)

    in_channels, latent_dim, hidden_dims = 3, 32, (64, 512)
    params = init_vae_params(pkey, in_channels, latent_dim, hidden_dims)

    x = jax.random.normal(xkey, (2, in_channels, 16, 16), jnp.float32)

    recon, inp, mu, log_var = vae_forward(params, x, ekey, a_decoder=True)
    jax.block_until_ready((recon, mu, log_var))

    assert recon.shape == (2, 3, 16, 16), recon.shape
    assert mu.shape == (2, latent_dim) and log_var.shape == (2, latent_dim)
    assert bool(jnp.all(jnp.isfinite(recon)))
    print("KERNEL_OK")
</pallas_src>

<mosaic_0001>
module attributes {stable_mosaic.version = 11 : i64} {
  func.func @_mm_kernel_single(%arg0: i32, %arg1: i32, %arg2: memref<16x32xbf16, #tpu.memory_space<vmem>>, %arg3: memref<32x128xbf16, #tpu.memory_space<vmem>>, %arg4: memref<1x128xf32, #tpu.memory_space<vmem>>, %arg5: memref<16x128xf32, #tpu.memory_space<vmem>>) attributes {dimension_semantics = [#tpu.dimension_semantics<parallel>, #tpu.dimension_semantics<parallel>], iteration_bounds = array<i64: 1, 1>, scalar_prefetch = 0 : i64, scratch_operands = 0 : i64, tpu.core_type = #tpu.core_type<tc>, window_params = [{transform_indices = @transform_0, window_bounds = array<i64: 16, 32>}, {transform_indices = @transform_1, window_bounds = array<i64: 32, 128>}, {transform_indices = @transform_2, window_bounds = array<i64: 1, 128>}, {transform_indices = @transform_3, window_bounds = array<i64: 16, 128>}]} {
    %c0 = arith.constant 0 : index
    %c0_0 = arith.constant 0 : index
    %0 = vector.load %arg2[%c0, %c0_0] : memref<16x32xbf16, #tpu.memory_space<vmem>>, vector<16x32xbf16>
    %c0_1 = arith.constant 0 : index
    %c0_2 = arith.constant 0 : index
    %1 = vector.load %arg3[%c0_1, %c0_2] : memref<32x128xbf16, #tpu.memory_space<vmem>>, vector<32x128xbf16>
    %cst = arith.constant dense<0.000000e+00> : vector<16x128xf32>
    %2 = tpu.matmul %0, %1, %cst {dimension_numbers = #tpu.dot_dimension_numbers<[1], [0], [0], [1], [0, 0, 1, 1], [], []>} : vector<16x32xbf16>, vector<32x128xbf16>, vector<16x128xf32> -> vector<16x128xf32>
    %c0_3 = arith.constant 0 : index
    %c0_4 = arith.constant 0 : index
    %3 = vector.load %arg4[%c0_3, %c0_4] : memref<1x128xf32, #tpu.memory_space<vmem>>, vector<1x128xf32>
    %4 = vector.broadcast %3 : vector<1x128xf32> to vector<16x128xf32>
    %5 = arith.addf %2, %4 : vector<16x128xf32>
    %c0_5 = arith.constant 0 : index
    %c0_6 = arith.constant 0 : index
    %6 = vector.load %arg5[%c0_5, %c0_6] : memref<16x128xf32, #tpu.memory_space<vmem>>, vector<16x128xf32>
    tpu.vector_store %arg5[%c0_5, %c0_6], %5 {strides = array<i32>} : memref<16x128xf32, #tpu.memory_space<vmem>>, vector<16x128xf32>,
    return
  }
  func.func @transform_0(%arg0: i32, %arg1: i32) -> (i32, i32) {
    %c0_i32 = arith.constant 0 : i32
    %c0_i32_0 = arith.constant 0 : i32
    return %arg0, %c0_i32 : i32, i32
  }
  func.func @transform_1(%arg0: i32, %arg1: i32) -> (i32, i32) {
    %c0_i32 = arith.constant 0 : i32
    %c0_i32_0 = arith.constant 0 : i32
    return %c0_i32, %arg1 : i32, i32
  }
  func.func @transform_2(%arg0: i32, %arg1: i32) -> (i32, i32) {
    %c0_i32 = arith.constant 0 : i32
    %c0_i32_0 = arith.constant 0 : i32
    return %c0_i32, %arg1 : i32, i32
  }
  func.func @transform_3(%arg0: i32, %arg1: i32) -> (i32, i32) {
    %c0_i32 = arith.constant 0 : i32
    return %arg0, %arg1 : i32, i32
  }
}

</mosaic_0001>

<bundles_post_ra>
// kernel: tpu_custom_call.1
= control target key start
LH: loop header
LB: loop body
LE: loop exit
PB: predicated region body
PF: predicated region fallthrough
CT: control target
= control target key end

     0   :  { %8 = vsyncpa [#allocation3], 0  ;;  %s307_s0 = inlined_call_operand.hbm [shape: bf16[16,32], index: 0, kind: input, shape index: {}]   ;;  %s308_s1 = inlined_call_operand.hbm [shape: bf16[32,128], index: 1, kind: input, shape index: {}]   ;;  %s309_s2 = inlined_call_operand.vmem [shape: f32[1,128], index: 2, kind: input, shape index: {}]   ;;  %s310_s3 = inlined_call_operand.hbm [shape: f32[16,128], index: 3, kind: output, shape index: {}]  }
   0x1   :  { %9 = vsyncpa [#allocation6], 0 }
   0x2   :  { %10 = vsyncpa [#allocation4], 0  ;;  %s239_s12 = smov [#allocation2]   ;;  %s167_s16 = scalar_lea.hbm %s307_s0, 128 }
   0x3   :  { %s16_s13 = sshll.u32 %s239_s12, 4  ;;  %p168_p0 = scmp.ne.s32.totalorder %s307_s0, %s167_s16  ;;  %s17_s13 = int_to_ptr.vmem [resolvable:$true] %s16_s13 }
   0x4   :  { %p171_p1 = scmp.lt.u32.totalorder %s167_s16, %s307_s0 }
   0x6   :  { %p173_p2 = pnand %p171_p1, %p168_p0 }
   0x8   :  { %176 = shalt.err (!%p173_p2)
}
   0x9   :  { %s177_s21 = scalar_lea.vmem %s17_s13, 128  ;;  %p182_p4 = scmp.lt.s32.totalorder %s17_s13, %s17_s13 }
   0xa   :  { %p178_p3 = scmp.ne.s32.totalorder %s17_s13, %s177_s21  ;;  %p183_p5 = scmp.lt.s32.totalorder %s177_s21, %s177_s21 }
   0xc   :  { %p184_p6 = por %p183_p5, %p182_p4 }
   0xe   :  { %p185_p7 = pnand %p184_p6, %p178_p3 }
  0x10   :  { %188 = shalt.err (!%p185_p7)
}
  0x11   :  { %s240_s22 = smov 64   ;;  %s241_s23 = smov 4  }
  0x12   :  { %22 = dma.hbm_to_vmem [thread:$0]  %s307_s0, 128, %s17_s13, [#allocation3], %s240_s22, %s240_s22, %s241_s23  }
  0x13   :  { %s242_s26 = smov [#allocation5]   ;;  %s189_s30 = scalar_lea.hbm %s308_s1, 256 }
  0x14   :  { %s28_s27 = sshll.u32 %s242_s26, 4  ;;  %p190_p8 = scmp.ne.s32.totalorder %s308_s1, %s189_s30  ;;  %s29_s27 = int_to_ptr.vmem [resolvable:$true] %s28_s27 }
  0x15   :  { %p193_p9 = scmp.lt.u32.totalorder %s189_s30, %s308_s1 }
  0x17   :  { %p195_p10 = pnand %p193_p9, %p190_p8 }
  0x19   :  { %198 = shalt.err (!%p195_p10)
}
  0x1a   :  { %s199_s8 = scalar_lea.vmem %s29_s27, 256  ;;  %p204_p12 = scmp.lt.s32.totalorder %s29_s27, %s29_s27 }
  0x1b   :  { %p200_p11 = scmp.ne.s32.totalorder %s29_s27, %s199_s8  ;;  %p205_p13 = scmp.lt.s32.totalorder %s199_s8, %s199_s8 }
  0x1d   :  { %p206_p0 = por %p205_p13, %p204_p12 }
  0x1f   :  { %p207_p1 = pnand %p206_p0, %p200_p11 }
  0x21   :  { %210 = shalt.err (!%p207_p1)
}
  0x22   :  { %34 = dma.hbm_to_vmem [thread:$0]  %s308_s1, 256, %s29_s27, [#allocation6], %s240_s22, %s240_s22, %s241_s23  }
  0x23   :  { %233 = dma.done.wait [#allocation3], 128  }
  0x24   :  { %234 = vsyncadd [#allocation3], 4294967168 }
  0x25   :  { %235 = dma.done.wait [#allocation6], 256  }
  0x26   :  { %236 = vsyncadd [#allocation6], 4294967040  ;;  %v243_v0 = vmov 0.0   ;;  %vm244_vm0 = vmmov 0   ;;  %v164_v1 = vld [vmem:[#allocation5] sm:$0xff]   ;;  %v165_v2 = vld [vmem:[#allocation5 + $0x8] sm:$0xff]  }
  0x27   :  { %147 = vmatprep.subr.bf16.mxu0 %v243_v0  ;;  %151 = vmatprep.mubr.msk.bf16.mxu0 %vm244_vm0, %v243_v0  ;;  %v166_v3 = vld [vmem:[#allocation2] sm:$0xff]   ;;  %vm74_vm1 = vcmask 261120   ;;  %s245_s1 = smov [#allocation7]  }
  0x28   :  { %148 = vmatpush3.bf16.msra.mxu0 %v164_v1  ;;  %v139_v4 = vld [vmem:[%s309_s2] ss:$0 sm:$0xff]  ;;  %s126_s12 = sshll.u32 %s245_s1, 4  ;;  %s127_s12 = int_to_ptr.vmem [resolvable:$true] %s126_s12 }
  0x29   :  { %149 = vmatprep.subr.bf16.mxu0 %v243_v0  ;;  %s211_s13 = scalar_lea.vmem %s127_s12, 256  ;;  %p216_p3 = scmp.lt.s32.totalorder %s127_s12, %s127_s12 }
  0x2a   :  { %p212_p2 = scmp.ne.s32.totalorder %s127_s12, %s211_s13  ;;  %p217_p4 = scmp.lt.s32.totalorder %s211_s13, %s211_s13 }
  0x2c   :  { %150 = vmatpush3.bf16.msra.mxu0 %v165_v2  ;;  %p218_p5 = por %p217_p4, %p216_p3 }
  0x2e   :  { %p219_p6 = pnand %p218_p5, %p212_p2 }
  0x2f   :  { %152 = vmatmul.mubr.msk.bf16.vlgmr.msra.gmra.mrb[0].mxu0 %vm74_vm1, %v166_v3 }
 0x102   :  { %v112_v5 = vpop.f32.mrb[0].mxu0 }
 0x103   :  { %v113_v6 = vadd.f32 %v139_v4, %v112_v5  ;;  %v153_v7 = vpop.f32.mrb[1].mxu0 }
 0x104   :  { %v115_v8 = vpop.f32.mrb[2].mxu0 }
 0x105   :  { %119 = vst [vmem:[#allocation7] sm:$0xff] %v113_v6  ;;  %v116_v9 = vadd.f32 %v139_v4, %v115_v8  ;;  %v154_v10 = vpop.f32.mrb[3].mxu0 }
 0x107   :  { %120 = vst [vmem:[#allocation7 + $0x8] sm:$0xff] %v116_v9 }
 0x108   :  { %222 = shalt.err (!%p219_p6)
}
 0x109   :  { %s223_s15 = scalar_lea.hbm %s310_s3, 256 }
 0x10a   :  { %p224_p7 = scmp.ne.s32.totalorder %s310_s3, %s223_s15  ;;  %p227_p8 = scmp.lt.u32.totalorder %s223_s15, %s310_s3 }
 0x10c   :  { %p229_p9 = pnand %p227_p8, %p224_p7 }
 0x10e   :  { %232 = shalt.err (!%p229_p9)
}
 0x10f   :  { %s246_s20 = smov 128   ;;  %s247_s21 = smov 8  }
 0x110   :  { %132 = dma.vmem_to_hbm [thread:$0]  %s127_s12, 256, %s310_s3, [#allocation4], %s246_s20, %s246_s20, %s247_s21  }
 0x111   :  { %237 = dma.done.wait [#allocation4], 256  }
 0x112   :  { %238 = vsyncadd [#allocation4], 4294967040 }
 0x113   :  { %136 = vsyncpa [#allocation3], 1 }
 0x114   :  { %137 = vsyncpa [#allocation6], 1 }
 0x115   :  { %138 = vsyncpa [#allocation4], 1 }

</bundles_post_ra>
